<compile_context>
chip_gen: v6e
topology: v6e:2x2x1
jax: 0.10.0
libtpu: 0.0.40
codegen_flags: <defaults>
</compile_context>

<pallas_src>
import math

import jax
import jax.numpy as jnp
from jax import lax
from jax.experimental import pallas as pl
from jax.experimental.pallas import tpu as pltpu  # available for CompilerParams if a grid is reintroduced

# ---- model dims (small, consistent with the forward semantics) ----
BATCH = 2
SEQ = 8
HIDDEN = 32
NUM_HEADS = 2
HEAD_DIM = HIDDEN // NUM_HEADS
INTERMEDIATE = 64
NUM_CLASSES = 2
VOCAB = 50
TYPE_VOCAB = 2
LN_EPS = 1e-12

# ---- packed-slab layout (row offsets are trace-time Python ints) ----
_MAT_ORDER = ["wq", "wk", "wv", "wo", "w1", "w2", "pool_w", "cls_w"]
_VEC_ORDER = ["ln0_g", "ln0_b", "bq", "bk", "bv", "bo", "ln1_g", "ln1_b",
              "b1", "b2", "ln2_g", "ln2_b", "pool_b", "cls_b"]
_V_IDX = {n: i for i, n in enumerate(_VEC_ORDER)}

W_LANES = max(HIDDEN, INTERMEDIATE)   # 64 -- widest matmul weight (w1)
V_LANES = max(HIDDEN, INTERMEDIATE)   # 64 -- widest bias (b1)

R_WQ = 0
R_WK = R_WQ + HIDDEN
R_WV = R_WK + HIDDEN
R_WO = R_WV + HIDDEN
R_W1 = R_WO + HIDDEN
R_W2 = R_W1 + HIDDEN
R_POOL = R_W2 + INTERMEDIATE
R_CLS = R_POOL + HIDDEN
W_ROWS = R_CLS + HIDDEN               # 288


def _layernorm(x, g, b):
    mu = jnp.mean(x, axis=-1, keepdims=True)
    var = jnp.mean((x - mu) ** 2, axis=-1, keepdims=True)
    return (x - mu) * lax.rsqrt(var + LN_EPS) * g + b


def _softmax(s):
    m = jnp.max(s, axis=-1, keepdims=True)
    e = jnp.exp(s - m)
    # EUP reciprocal instead of a VALU divide.
    return e * pl.reciprocal(jnp.sum(e, axis=-1, keepdims=True), approx=True)


def _gelu(x):
    # TODO(synk): BERT's exact erf-GELU approximated with the tanh form (EUP-friendly).
    return 0.5 * x * (1.0 + jnp.tanh(0.7978845608028654 * (x + 0.044715 * x * x * x)))


def bert_cls_kernel(emb_ref, mask_ref, w_ref, v_ref, out_ref):
    f32 = jnp.float32
    bf16 = jnp.bfloat16

    def mat(r0, rows, cols):          # static carve from the bf16 weight slab
        return w_ref[r0:r0 + rows, 0:cols]

    def vec(name, width):             # static carve from the f32 vector slab, shape (1, width)
        i = _V_IDX[name]
        return v_ref[i:i + 1, 0:width]

    x = emb_ref[...]                  # (B*S, H) f32 -- summed embeddings, batch-flattened
    mask = mask_ref[...]              # (B, S) f32   -- 1.0 valid, 0.0 padding
    neg_bias = (1.0 - mask) * (-1e9)  # (B, S)

    # --- embedding layernorm (all tokens) ---
    h = _layernorm(x, vec("ln0_g", HIDDEN), vec("ln0_b", HIDDEN))
    hb = h.astype(bf16)

    # --- QKV projections: one fat matmul each over all B*S rows, bf16 on the MXU ---
    q = jnp.dot(hb, mat(R_WQ, HIDDEN, HIDDEN), preferred_element_type=f32) + vec("bq", HIDDEN)
    k = jnp.dot(hb, mat(R_WK, HIDDEN, HIDDEN), preferred_element_type=f32) + vec("bk", HIDDEN)
    v = jnp.dot(hb, mat(R_WV, HIDDEN, HIDDEN), preferred_element_type=f32) + vec("bv", HIDDEN)
    qb, kb, vb = q.astype(bf16), k.astype(bf16), v.astype(bf16)

    scale = 1.0 / math.sqrt(HEAD_DIM)
    bo = vec("bo", HIDDEN)
    ln1_g, ln1_b = vec("ln1_g", HIDDEN), vec("ln1_b", HIDDEN)

    cls_rows = []
    for b in range(BATCH):            # trace-time unrolled (B is tiny)
        r0 = b * SEQ
        nb = neg_bias[b:b + 1, :]     # (1, S) key-mask bias, broadcast over query rows
        attn = None
        for hd in range(NUM_HEADS):   # trace-time unrolled
            c0 = hd * HEAD_DIM
            qh = qb[r0:r0 + SEQ, c0:c0 + HEAD_DIM]
            kh = kb[r0:r0 + SEQ, c0:c0 + HEAD_DIM]
            vh = vb[r0:r0 + SEQ, c0:c0 + HEAD_DIM]
            # q @ k^T without materializing a transpose (contract last dim of both).
            s = lax.dot_general(qh, kh, (((1,), (1,)), ((), ())),
                                preferred_element_type=f32) * scale + nb        # (S, S) f32
            p = _softmax(s)                                                      # f32
            ctx = jnp.dot(p.astype(bf16), vh, preferred_element_type=f32)        # (S, HD)
            # fold the head "concat" into the output projection: ctx_h @ W_o[h*HD:(h+1)*HD, :]
            wo_h = mat(R_WO + c0, HEAD_DIM, HIDDEN)
            part = jnp.dot(ctx.astype(bf16), wo_h, preferred_element_type=f32)   # (S, H)
            attn = part if attn is None else attn + part
        h1_b = _layernorm(h[r0:r0 + SEQ, :] + attn + bo, ln1_g, ln1_b)           # (S, H)
        cls_rows.append(h1_b[0:1, :])     # only the [CLS] row feeds the pooler
    h1_cls = jnp.concatenate(cls_rows, axis=0)                                   # (B, H)

    # --- FFN + LN2 + pooler + classifier on the CLS rows only ---
    ff = _gelu(jnp.dot(h1_cls.astype(bf16), mat(R_W1, HIDDEN, INTERMEDIATE),
                       preferred_element_type=f32) + vec("b1", INTERMEDIATE))    # (B, I)
    ff_out = jnp.dot(ff.astype(bf16), mat(R_W2, INTERMEDIATE, HIDDEN),
                     preferred_element_type=f32) + vec("b2", HIDDEN)             # (B, H)
    h2 = _layernorm(h1_cls + ff_out, vec("ln2_g", HIDDEN), vec("ln2_b", HIDDEN))

    pooled = jnp.tanh(jnp.dot(h2.astype(bf16), mat(R_POOL, HIDDEN, HIDDEN),
                              preferred_element_type=f32) + vec("pool_b", HIDDEN))
    # classifier head (nn.Linear(hidden, num_classes)); dr_rate=None -> no dropout
    logits = jnp.dot(pooled.astype(bf16), mat(R_CLS, HIDDEN, NUM_CLASSES),
                     preferred_element_type=f32) + vec("cls_b", NUM_CLASSES)
    out_ref[...] = logits                                                        # (B, C)


def init_params(key):
    ks = jax.random.split(key, 16)
    s = 0.02
    p = {}
    p["word_emb"] = jax.random.normal(ks[0], (VOCAB, HIDDEN), jnp.float32) * s
    p["pos_emb"] = jax.random.normal(ks[1], (SEQ, HIDDEN), jnp.float32) * s
    p["type_emb"] = jax.random.normal(ks[2], (TYPE_VOCAB, HIDDEN), jnp.float32) * s
    p["ln0_g"] = jnp.ones((1, HIDDEN), jnp.float32)
    p["ln0_b"] = jnp.zeros((1, HIDDEN), jnp.float32)
    p["wq"] = jax.random.normal(ks[3], (HIDDEN, HIDDEN), jnp.float32) * s
    p["bq"] = jnp.zeros((1, HIDDEN), jnp.float32)
    p["wk"] = jax.random.normal(ks[4], (HIDDEN, HIDDEN), jnp.float32) * s
    p["bk"] = jnp.zeros((1, HIDDEN), jnp.float32)
    p["wv"] = jax.random.normal(ks[5], (HIDDEN, HIDDEN), jnp.float32) * s
    p["bv"] = jnp.zeros((1, HIDDEN), jnp.float32)
    p["wo"] = jax.random.normal(ks[6], (HIDDEN, HIDDEN), jnp.float32) * s
    p["bo"] = jnp.zeros((1, HIDDEN), jnp.float32)
    p["ln1_g"] = jnp.ones((1, HIDDEN), jnp.float32)
    p["ln1_b"] = jnp.zeros((1, HIDDEN), jnp.float32)
    p["w1"] = jax.random.normal(ks[7], (HIDDEN, INTERMEDIATE), jnp.float32) * s
    p["b1"] = jnp.zeros((1, INTERMEDIATE), jnp.float32)
    p["w2"] = jax.random.normal(ks[8], (INTERMEDIATE, HIDDEN), jnp.float32) * s
    p["b2"] = jnp.zeros((1, HIDDEN), jnp.float32)
    p["ln2_g"] = jnp.ones((1, HIDDEN), jnp.float32)
    p["ln2_b"] = jnp.zeros((1, HIDDEN), jnp.float32)
    p["pool_w"] = jax.random.normal(ks[9], (HIDDEN, HIDDEN), jnp.float32) * s
    p["pool_b"] = jnp.zeros((1, HIDDEN), jnp.float32)
    # classifier stored as (H, C) == W.T of nn.Linear(hidden, num_classes)
    p["cls_w"] = jax.random.normal(ks[10], (HIDDEN, NUM_CLASSES), jnp.float32) * s
    p["cls_b"] = jnp.zeros((1, NUM_CLASSES), jnp.float32)
    return p


def pack_params(p):
    """Pack all matmul weights into one bf16 slab and all (1, width) vectors into one f32 slab."""
    def pad_cols(m, lanes):
        return jnp.pad(m, ((0, 0), (0, lanes - m.shape[1])))

    w_slab = jnp.concatenate([pad_cols(p[n], W_LANES) for n in _MAT_ORDER],
                             axis=0).astype(jnp.bfloat16)              # (W_ROWS, W_LANES)
    assert w_slab.shape == (W_ROWS, W_LANES)
    v_slab = jnp.concatenate([pad_cols(p[n], V_LANES) for n in _VEC_ORDER],
                             axis=0).astype(jnp.float32)               # (len(_VEC_ORDER), V_LANES)
    return {"word_emb": p["word_emb"], "pos_emb": p["pos_emb"], "type_emb": p["type_emb"],
            "w_slab": w_slab, "v_slab": v_slab}


@jax.jit
def bert_classifier_forward(packed, token_ids, valid_length, segment_ids):
    B, S = token_ids.shape

    # gen_attention_mask: mask[i, :valid_length[i]] = 1  (float)
    attention_mask = (jnp.arange(S, dtype=jnp.int32)[None, :]
                      < valid_length[:, None]).astype(jnp.float32)          # (B, S)

    # embedding lookups are gather glue; everything after runs inside the kernel
    emb = (packed["word_emb"][token_ids]
           + packed["pos_emb"][None, :S, :]
           + packed["type_emb"][segment_ids]).astype(jnp.float32)           # (B, S, H)
    emb2d = emb.reshape(B * S, HIDDEN)                                      # batch-flattened rows

    # Single un-gridded pallas_call: the whole problem fits VMEM, so one fat step
    # avoids per-grid-step pipeline overhead and issues each weight DMA exactly once.
    # TODO(synk): on v7x (2 TensorCores) a batch-parallel grid with
    # dimension_semantics=("parallel",) would use the second core once B grows.
    logits = pl.pallas_call(
        bert_cls_kernel,
        out_shape=jax.ShapeDtypeStruct((B, NUM_CLASSES), jnp.float32),
    )(emb2d, attention_mask, packed["w_slab"], packed["v_slab"])
    return logits                                                            # (B, num_classes)


if __name__ == "__main__":
    key = jax.random.PRNGKey(0)
    pkey, tkey, skey = jax.random.split(key, 3)

    params = init_params(pkey)
    packed = pack_params(params)

    token_ids = jax.random.randint(tkey, (BATCH, SEQ), 0, VOCAB, dtype=jnp.int32)
    segment_ids = jax.random.randint(skey, (BATCH, SEQ), 0, TYPE_VOCAB, dtype=jnp.int32)
    valid_length = jnp.array([SEQ, SEQ // 2], dtype=jnp.int32)

    logits = bert_classifier_forward(packed, token_ids, valid_length, segment_ids)
    logits = jax.block_until_ready(logits)

    assert logits.shape == (BATCH, NUM_CLASSES)
    assert bool(jnp.all(jnp.isfinite(logits)))
    print("KERNEL_OK")
</pallas_src>

<mosaic_0001>
module attributes {stable_mosaic.version = 11 : i64} {
  func.func @bert_cls_kernel(%arg0: memref<16x32xf32, #tpu.memory_space<vmem>>, %arg1: memref<2x8xf32, #tpu.memory_space<vmem>>, %arg2: memref<288x64xbf16, #tpu.memory_space<vmem>>, %arg3: memref<14x64xf32, #tpu.memory_space<vmem>>, %arg4: memref<2x2xf32, #tpu.memory_space<vmem>>) attributes {dimension_semantics = [], scalar_prefetch = 0 : i64, scratch_operands = 0 : i64, tpu.core_type = #tpu.core_type<tc>} {
    %c0 = arith.constant 0 : index
    %c0_0 = arith.constant 0 : index
    %0 = vector.load %arg0[%c0, %c0_0] : memref<16x32xf32, #tpu.memory_space<vmem>>, vector<16x32xf32>
    %c0_1 = arith.constant 0 : index
    %c0_2 = arith.constant 0 : index
    %1 = vector.load %arg1[%c0_1, %c0_2] : memref<2x8xf32, #tpu.memory_space<vmem>>, vector<2x8xf32>
    %cst = arith.constant 1.000000e+00 : f32
    %2 = vector.broadcast %cst : f32 to vector<2x8xf32>
    %3 = arith.subf %2, %1 : vector<2x8xf32>
    %cst_3 = arith.constant -1.000000e+09 : f32
    %4 = vector.broadcast %cst_3 : f32 to vector<2x8xf32>
    %5 = arith.mulf %3, %4 : vector<2x8xf32>
    %c0_4 = arith.constant 0 : index
    %c0_5 = arith.constant 0 : index
    %6 = vector.load %arg3[%c0_4, %c0_5] : memref<14x64xf32, #tpu.memory_space<vmem>>, vector<1x32xf32>
    %c1 = arith.constant 1 : index
    %c0_6 = arith.constant 0 : index
    %7 = vector.load %arg3[%c1, %c0_6] : memref<14x64xf32, #tpu.memory_space<vmem>>, vector<1x32xf32>
    %cst_7 = arith.constant dense<0.000000e+00> : vector<16xf32>
    %8 = vector.multi_reduction <add>, %0, %cst_7 [1] : vector<16x32xf32> to vector<16xf32>
    %9 = vector.shape_cast %8 : vector<16xf32> to vector<16x1xf32>
    %cst_8 = arith.constant 3.200000e+01 : f32
    %10 = vector.broadcast %cst_8 : f32 to vector<16x1xf32>
    %11 = arith.divf %9, %10 : vector<16x1xf32>
    %12 = vector.broadcast %11 : vector<16x1xf32> to vector<16x32xf32>
    %13 = arith.subf %0, %12 : vector<16x32xf32>
    %14 = arith.mulf %13, %13 : vector<16x32xf32>
    %cst_9 = arith.constant dense<0.000000e+00> : vector<16xf32>
    %15 = vector.multi_reduction <add>, %14, %cst_9 [1] : vector<16x32xf32> to vector<16xf32>
    %16 = vector.shape_cast %15 : vector<16xf32> to vector<16x1xf32>
    %cst_10 = arith.constant 3.200000e+01 : f32
    %17 = vector.broadcast %cst_10 : f32 to vector<16x1xf32>
    %18 = arith.divf %16, %17 : vector<16x1xf32>
    %19 = vector.broadcast %11 : vector<16x1xf32> to vector<16x32xf32>
    %20 = arith.subf %0, %19 : vector<16x32xf32>
    %cst_11 = arith.constant 9.99999996E-13 : f32
    %21 = vector.broadcast %cst_11 : f32 to vector<16x1xf32>
    %22 = arith.addf %18, %21 : vector<16x1xf32>
    %23 = math.rsqrt %22 : vector<16x1xf32>
    %24 = vector.broadcast %23 : vector<16x1xf32> to vector<16x32xf32>
    %25 = arith.mulf %20, %24 : vector<16x32xf32>
    %26 = vector.broadcast %6 : vector<1x32xf32> to vector<16x32xf32>
    %27 = arith.mulf %25, %26 : vector<16x32xf32>
    %28 = vector.broadcast %7 : vector<1x32xf32> to vector<16x32xf32>
    %29 = arith.addf %27, %28 : vector<16x32xf32>
    %30 = arith.truncf %29 : vector<16x32xf32> to vector<16x32xbf16>
    %c0_12 = arith.constant 0 : index
    %c0_13 = arith.constant 0 : index
    %31 = vector.load %arg2[%c0_12, %c0_13] : memref<288x64xbf16, #tpu.memory_space<vmem>>, vector<32x32xbf16>
    %cst_14 = arith.constant dense<0.000000e+00> : vector<16x32xf32>
    %32 = tpu.matmul %30, %31, %cst_14 {dimension_numbers = #tpu.dot_dimension_numbers<[1], [0], [0], [1], [0, 0, 1, 1], [], []>} : vector<16x32xbf16>, vector<32x32xbf16>, vector<16x32xf32> -> vector<16x32xf32>
    %c2 = arith.constant 2 : index
    %c0_15 = arith.constant 0 : index
    %33 = vector.load %arg3[%c2, %c0_15] : memref<14x64xf32, #tpu.memory_space<vmem>>, vector<1x32xf32>
    %34 = vector.broadcast %33 : vector<1x32xf32> to vector<16x32xf32>
    %35 = arith.addf %32, %34 : vector<16x32xf32>
    %c32 = arith.constant 32 : index
    %c0_16 = arith.constant 0 : index
    %36 = vector.load %arg2[%c32, %c0_16] : memref<288x64xbf16, #tpu.memory_space<vmem>>, vector<32x32xbf16>
    %cst_17 = arith.constant dense<0.000000e+00> : vector<16x32xf32>
    %37 = tpu.matmul %30, %36, %cst_17 {dimension_numbers = #tpu.dot_dimension_numbers<[1], [0], [0], [1], [0, 0, 1, 1], [], []>} : vector<16x32xbf16>, vector<32x32xbf16>, vector<16x32xf32> -> vector<16x32xf32>
    %c3 = arith.constant 3 : index
    %c0_18 = arith.constant 0 : index
    %38 = vector.load %arg3[%c3, %c0_18] : memref<14x64xf32, #tpu.memory_space<vmem>>, vector<1x32xf32>
    %39 = vector.broadcast %38 : vector<1x32xf32> to vector<16x32xf32>
    %40 = arith.addf %37, %39 : vector<16x32xf32>
    %c64 = arith.constant 64 : index
    %c0_19 = arith.constant 0 : index
    %41 = vector.load %arg2[%c64, %c0_19] : memref<288x64xbf16, #tpu.memory_space<vmem>>, vector<32x32xbf16>
    %cst_20 = arith.constant dense<0.000000e+00> : vector<16x32xf32>
    %42 = tpu.matmul %30, %41, %cst_20 {dimension_numbers = #tpu.dot_dimension_numbers<[1], [0], [0], [1], [0, 0, 1, 1], [], []>} : vector<16x32xbf16>, vector<32x32xbf16>, vector<16x32xf32> -> vector<16x32xf32>
    %c4 = arith.constant 4 : index
    %c0_21 = arith.constant 0 : index
    %43 = vector.load %arg3[%c4, %c0_21] : memref<14x64xf32, #tpu.memory_space<vmem>>, vector<1x32xf32>
    %44 = vector.broadcast %43 : vector<1x32xf32> to vector<16x32xf32>
    %45 = arith.addf %42, %44 : vector<16x32xf32>
    %46 = arith.truncf %35 : vector<16x32xf32> to vector<16x32xbf16>
    %47 = arith.truncf %40 : vector<16x32xf32> to vector<16x32xbf16>
    %48 = arith.truncf %45 : vector<16x32xf32> to vector<16x32xbf16>
    %c5 = arith.constant 5 : index
    %c0_22 = arith.constant 0 : index
    %49 = vector.load %arg3[%c5, %c0_22] : memref<14x64xf32, #tpu.memory_space<vmem>>, vector<1x32xf32>
    %c6 = arith.constant 6 : index
    %c0_23 = arith.constant 0 : index
    %50 = vector.load %arg3[%c6, %c0_23] : memref<14x64xf32, #tpu.memory_space<vmem>>, vector<1x32xf32>
    %c7 = arith.constant 7 : index
    %c0_24 = arith.constant 0 : index
    %51 = vector.load %arg3[%c7, %c0_24] : memref<14x64xf32, #tpu.memory_space<vmem>>, vector<1x32xf32>
    %52 = vector.extract_strided_slice %5 {offsets = [0, 0], sizes = [1, 8], strides = [1, 1]} : vector<2x8xf32> to vector<1x8xf32>
    %53 = vector.extract_strided_slice %46 {offsets = [0, 0], sizes = [8, 16], strides = [1, 1]} : vector<16x32xbf16> to vector<8x16xbf16>
    %54 = vector.extract_strided_slice %47 {offsets = [0, 0], sizes = [8, 16], strides = [1, 1]} : vector<16x32xbf16> to vector<8x16xbf16>
    %55 = vector.extract_strided_slice %48 {offsets = [0, 0], sizes = [8, 16], strides = [1, 1]} : vector<16x32xbf16> to vector<8x16xbf16>
    %cst_25 = arith.constant dense<0.000000e+00> : vector<8x8xf32>
    %56 = tpu.matmul %53, %54, %cst_25 {dimension_numbers = #tpu.dot_dimension_numbers<[1], [1], [0], [0], [0, 0, 1, 0], [], []>} : vector<8x16xbf16>, vector<8x16xbf16>, vector<8x8xf32> -> vector<8x8xf32>
    %cst_26 = arith.constant 2.500000e-01 : f32
    %57 = vector.broadcast %cst_26 : f32 to vector<8x8xf32>
    %58 = arith.mulf %56, %57 : vector<8x8xf32>
    %59 = vector.broadcast %52 : vector<1x8xf32> to vector<8x8xf32>
    %60 = arith.addf %58, %59 : vector<8x8xf32>
    %cst_27 = arith.constant dense<0xFF800000> : vector<8xf32>
    %61 = vector.multi_reduction <maximumf>, %60, %cst_27 [1] : vector<8x8xf32> to vector<8xf32>
    %62 = vector.shape_cast %61 : vector<8xf32> to vector<8x1xf32>
    %63 = vector.broadcast %62 : vector<8x1xf32> to vector<8x8xf32>
    %64 = arith.subf %60, %63 : vector<8x8xf32>
    %65 = math.exp %64 : vector<8x8xf32>
    %cst_28 = arith.constant dense<0.000000e+00> : vector<8xf32>
    %66 = vector.multi_reduction <add>, %65, %cst_28 [1] : vector<8x8xf32> to vector<8xf32>
    %67 = vector.shape_cast %66 : vector<8xf32> to vector<8x1xf32>
    %68 = tpu.reciprocal %67 {approx = true} : vector<8x1xf32> -> vector<8x1xf32>
    %69 = vector.broadcast %68 : vector<8x1xf32> to vector<8x8xf32>
    %70 = arith.mulf %65, %69 : vector<8x8xf32>
    %71 = arith.truncf %70 : vector<8x8xf32> to vector<8x8xbf16>
    %cst_29 = arith.constant dense<0.000000e+00> : vector<8x16xf32>
    %72 = tpu.matmul %71, %55, %cst_29 {dimension_numbers = #tpu.dot_dimension_numbers<[1], [0], [0], [1], [0, 0, 1, 1], [], []>} : vector<8x8xbf16>, vector<8x16xbf16>, vector<8x16xf32> -> vector<8x16xf32>
    %c96 = arith.constant 96 : index
    %c0_30 = arith.constant 0 : index
    %73 = vector.load %arg2[%c96, %c0_30] : memref<288x64xbf16, #tpu.memory_space<vmem>>, vector<16x32xbf16>
    %74 = arith.truncf %72 : vector<8x16xf32> to vector<8x16xbf16>
    %cst_31 = arith.constant dense<0.000000e+00> : vector<8x32xf32>
    %75 = tpu.matmul %74, %73, %cst_31 {dimension_numbers = #tpu.dot_dimension_numbers<[1], [0], [0], [1], [0, 0, 1, 1], [], []>} : vector<8x16xbf16>, vector<16x32xbf16>, vector<8x32xf32> -> vector<8x32xf32>
    %76 = vector.extract_strided_slice %46 {offsets = [0, 16], sizes = [8, 16], strides = [1, 1]} : vector<16x32xbf16> to vector<8x16xbf16>
    %77 = vector.extract_strided_slice %47 {offsets = [0, 16], sizes = [8, 16], strides = [1, 1]} : vector<16x32xbf16> to vector<8x16xbf16>
    %78 = vector.extract_strided_slice %48 {offsets = [0, 16], sizes = [8, 16], strides = [1, 1]} : vector<16x32xbf16> to vector<8x16xbf16>
    %cst_32 = arith.constant dense<0.000000e+00> : vector<8x8xf32>
    %79 = tpu.matmul %76, %77, %cst_32 {dimension_numbers = #tpu.dot_dimension_numbers<[1], [1], [0], [0], [0, 0, 1, 0], [], []>} : vector<8x16xbf16>, vector<8x16xbf16>, vector<8x8xf32> -> vector<8x8xf32>
    %cst_33 = arith.constant 2.500000e-01 : f32
    %80 = vector.broadcast %cst_33 : f32 to vector<8x8xf32>
    %81 = arith.mulf %79, %80 : vector<8x8xf32>
    %82 = vector.broadcast %52 : vector<1x8xf32> to vector<8x8xf32>
    %83 = arith.addf %81, %82 : vector<8x8xf32>
    %cst_34 = arith.constant dense<0xFF800000> : vector<8xf32>
    %84 = vector.multi_reduction <maximumf>, %83, %cst_34 [1] : vector<8x8xf32> to vector<8xf32>
    %85 = vector.shape_cast %84 : vector<8xf32> to vector<8x1xf32>
    %86 = vector.broadcast %85 : vector<8x1xf32> to vector<8x8xf32>
    %87 = arith.subf %83, %86 : vector<8x8xf32>
    %88 = math.exp %87 : vector<8x8xf32>
    %cst_35 = arith.constant dense<0.000000e+00> : vector<8xf32>
    %89 = vector.multi_reduction <add>, %88, %cst_35 [1] : vector<8x8xf32> to vector<8xf32>
    %90 = vector.shape_cast %89 : vector<8xf32> to vector<8x1xf32>
    %91 = tpu.reciprocal %90 {approx = true} : vector<8x1xf32> -> vector<8x1xf32>
    %92 = vector.broadcast %91 : vector<8x1xf32> to vector<8x8xf32>
    %93 = arith.mulf %88, %92 : vector<8x8xf32>
    %94 = arith.truncf %93 : vector<8x8xf32> to vector<8x8xbf16>
    %cst_36 = arith.constant dense<0.000000e+00> : vector<8x16xf32>
    %95 = tpu.matmul %94, %78, %cst_36 {dimension_numbers = #tpu.dot_dimension_numbers<[1], [0], [0], [1], [0, 0, 1, 1], [], []>} : vector<8x8xbf16>, vector<8x16xbf16>, vector<8x16xf32> -> vector<8x16xf32>
    %c112 = arith.constant 112 : index
    %c0_37 = arith.constant 0 : index
    %96 = vector.load %arg2[%c112, %c0_37] : memref<288x64xbf16, #tpu.memory_space<vmem>>, vector<16x32xbf16>
    %97 = arith.truncf %95 : vector<8x16xf32> to vector<8x16xbf16>
    %cst_38 = arith.constant dense<0.000000e+00> : vector<8x32xf32>
    %98 = tpu.matmul %97, %96, %cst_38 {dimension_numbers = #tpu.dot_dimension_numbers<[1], [0], [0], [1], [0, 0, 1, 1], [], []>} : vector<8x16xbf16>, vector<16x32xbf16>, vector<8x32xf32> -> vector<8x32xf32>
    %99 = arith.addf %75, %98 : vector<8x32xf32>
    %100 = vector.extract_strided_slice %29 {offsets = [0, 0], sizes = [8, 32], strides = [1, 1]} : vector<16x32xf32> to vector<8x32xf32>
    %101 = arith.addf %100, %99 : vector<8x32xf32>
    %102 = vector.broadcast %49 : vector<1x32xf32> to vector<8x32xf32>
    %103 = arith.addf %101, %102 : vector<8x32xf32>
    %cst_39 = arith.constant dense<0.000000e+00> : vector<8xf32>
    %104 = vector.multi_reduction <add>, %103, %cst_39 [1] : vector<8x32xf32> to vector<8xf32>
    %105 = vector.shape_cast %104 : vector<8xf32> to vector<8x1xf32>
    %cst_40 = arith.constant 3.200000e+01 : f32
    %106 = vector.broadcast %cst_40 : f32 to vector<8x1xf32>
    %107 = arith.divf %105, %106 : vector<8x1xf32>
    %108 = vector.broadcast %107 : vector<8x1xf32> to vector<8x32xf32>
    %109 = arith.subf %103, %108 : vector<8x32xf32>
    %110 = arith.mulf %109, %109 : vector<8x32xf32>
    %cst_41 = arith.constant dense<0.000000e+00> : vector<8xf32>
    %111 = vector.multi_reduction <add>, %110, %cst_41 [1] : vector<8x32xf32> to vector<8xf32>
    %112 = vector.shape_cast %111 : vector<8xf32> to vector<8x1xf32>
    %cst_42 = arith.constant 3.200000e+01 : f32
    %113 = vector.broadcast %cst_42 : f32 to vector<8x1xf32>
    %114 = arith.divf %112, %113 : vector<8x1xf32>
    %115 = vector.broadcast %107 : vector<8x1xf32> to vector<8x32xf32>
    %116 = arith.subf %103, %115 : vector<8x32xf32>
    %cst_43 = arith.constant 9.99999996E-13 : f32
    %117 = vector.broadcast %cst_43 : f32 to vector<8x1xf32>
    %118 = arith.addf %114, %117 : vector<8x1xf32>
    %119 = math.rsqrt %118 : vector<8x1xf32>
    %120 = vector.broadcast %119 : vector<8x1xf32> to vector<8x32xf32>
    %121 = arith.mulf %116, %120 : vector<8x32xf32>
    %122 = vector.broadcast %50 : vector<1x32xf32> to vector<8x32xf32>
    %123 = arith.mulf %121, %122 : vector<8x32xf32>
    %124 = vector.broadcast %51 : vector<1x32xf32> to vector<8x32xf32>
    %125 = arith.addf %123, %124 : vector<8x32xf32>
    %126 = vector.extract_strided_slice %125 {offsets = [0, 0], sizes = [1, 32], strides = [1, 1]} : vector<8x32xf32> to vector<1x32xf32>
    %127 = vector.extract_strided_slice %5 {offsets = [1, 0], sizes = [1, 8], strides = [1, 1]} : vector<2x8xf32> to vector<1x8xf32>
    %128 = vector.extract_strided_slice %46 {offsets = [8, 0], sizes = [8, 16], strides = [1, 1]} : vector<16x32xbf16> to vector<8x16xbf16>
    %129 = vector.extract_strided_slice %47 {offsets = [8, 0], sizes = [8, 16], strides = [1, 1]} : vector<16x32xbf16> to vector<8x16xbf16>
    %130 = vector.extract_strided_slice %48 {offsets = [8, 0], sizes = [8, 16], strides = [1, 1]} : vector<16x32xbf16> to vector<8x16xbf16>
    %cst_44 = arith.constant dense<0.000000e+00> : vector<8x8xf32>
    %131 = tpu.matmul %128, %129, %cst_44 {dimension_numbers = #tpu.dot_dimension_numbers<[1], [1], [0], [0], [0, 0, 1, 0], [], []>} : vector<8x16xbf16>, vector<8x16xbf16>, vector<8x8xf32> -> vector<8x8xf32>
    %cst_45 = arith.constant 2.500000e-01 : f32
    %132 = vector.broadcast %cst_45 : f32 to vector<8x8xf32>
    %133 = arith.mulf %131, %132 : vector<8x8xf32>
    %134 = vector.broadcast %127 : vector<1x8xf32> to vector<8x8xf32>
    %135 = arith.addf %133, %134 : vector<8x8xf32>
    %cst_46 = arith.constant dense<0xFF800000> : vector<8xf32>
    %136 = vector.multi_reduction <maximumf>, %135, %cst_46 [1] : vector<8x8xf32> to vector<8xf32>
    %137 = vector.shape_cast %136 : vector<8xf32> to vector<8x1xf32>
    %138 = vector.broadcast %137 : vector<8x1xf32> to vector<8x8xf32>
    %139 = arith.subf %135, %138 : vector<8x8xf32>
    %140 = math.exp %139 : vector<8x8xf32>
    %cst_47 = arith.constant dense<0.000000e+00> : vector<8xf32>
    %141 = vector.multi_reduction <add>, %140, %cst_47 [1] : vector<8x8xf32> to vector<8xf32>
    %142 = vector.shape_cast %141 : vector<8xf32> to vector<8x1xf32>
    %143 = tpu.reciprocal %142 {approx = true} : vector<8x1xf32> -> vector<8x1xf32>
    %144 = vector.broadcast %143 : vector<8x1xf32> to vector<8x8xf32>
    %145 = arith.mulf %140, %144 : vector<8x8xf32>
    %146 = arith.truncf %145 : vector<8x8xf32> to vector<8x8xbf16>
    %cst_48 = arith.constant dense<0.000000e+00> : vector<8x16xf32>
    %147 = tpu.matmul %146, %130, %cst_48 {dimension_numbers = #tpu.dot_dimension_numbers<[1], [0], [0], [1], [0, 0, 1, 1], [], []>} : vector<8x8xbf16>, vector<8x16xbf16>, vector<8x16xf32> -> vector<8x16xf32>
    %c96_49 = arith.constant 96 : index
    %c0_50 = arith.constant 0 : index
    %148 = vector.load %arg2[%c96_49, %c0_50] : memref<288x64xbf16, #tpu.memory_space<vmem>>, vector<16x32xbf16>
    %149 = arith.truncf %147 : vector<8x16xf32> to vector<8x16xbf16>
    %cst_51 = arith.constant dense<0.000000e+00> : vector<8x32xf32>
    %150 = tpu.matmul %149, %148, %cst_51 {dimension_numbers = #tpu.dot_dimension_numbers<[1], [0], [0], [1], [0, 0, 1, 1], [], []>} : vector<8x16xbf16>, vector<16x32xbf16>, vector<8x32xf32> -> vector<8x32xf32>
    %151 = vector.extract_strided_slice %46 {offsets = [8, 16], sizes = [8, 16], strides = [1, 1]} : vector<16x32xbf16> to vector<8x16xbf16>
    %152 = vector.extract_strided_slice %47 {offsets = [8, 16], sizes = [8, 16], strides = [1, 1]} : vector<16x32xbf16> to vector<8x16xbf16>
    %153 = vector.extract_strided_slice %48 {offsets = [8, 16], sizes = [8, 16], strides = [1, 1]} : vector<16x32xbf16> to vector<8x16xbf16>
    %cst_52 = arith.constant dense<0.000000e+00> : vector<8x8xf32>
    %154 = tpu.matmul %151, %152, %cst_52 {dimension_numbers = #tpu.dot_dimension_numbers<[1], [1], [0], [0], [0, 0, 1, 0], [], []>} : vector<8x16xbf16>, vector<8x16xbf16>, vector<8x8xf32> -> vector<8x8xf32>
    %cst_53 = arith.constant 2.500000e-01 : f32
    %155 = vector.broadcast %cst_53 : f32 to vector<8x8xf32>
    %156 = arith.mulf %154, %155 : vector<8x8xf32>
    %157 = vector.broadcast %127 : vector<1x8xf32> to vector<8x8xf32>
    %158 = arith.addf %156, %157 : vector<8x8xf32>
    %cst_54 = arith.constant dense<0xFF800000> : vector<8xf32>
    %159 = vector.multi_reduction <maximumf>, %158, %cst_54 [1] : vector<8x8xf32> to vector<8xf32>
    %160 = vector.shape_cast %159 : vector<8xf32> to vector<8x1xf32>
    %161 = vector.broadcast %160 : vector<8x1xf32> to vector<8x8xf32>
    %162 = arith.subf %158, %161 : vector<8x8xf32>
    %163 = math.exp %162 : vector<8x8xf32>
    %cst_55 = arith.constant dense<0.000000e+00> : vector<8xf32>
    %164 = vector.multi_reduction <add>, %163, %cst_55 [1] : vector<8x8xf32> to vector<8xf32>
    %165 = vector.shape_cast %164 : vector<8xf32> to vector<8x1xf32>
    %166 = tpu.reciprocal %165 {approx = true} : vector<8x1xf32> -> vector<8x1xf32>
    %167 = vector.broadcast %166 : vector<8x1xf32> to vector<8x8xf32>
    %168 = arith.mulf %163, %167 : vector<8x8xf32>
    %169 = arith.truncf %168 : vector<8x8xf32> to vector<8x8xbf16>
    %cst_56 = arith.constant dense<0.000000e+00> : vector<8x16xf32>
    %170 = tpu.matmul %169, %153, %cst_56 {dimension_numbers = #tpu.dot_dimension_numbers<[1], [0], [0], [1], [0, 0, 1, 1], [], []>} : vector<8x8xbf16>, vector<8x16xbf16>, vector<8x16xf32> -> vector<8x16xf32>
    %c112_57 = arith.constant 112 : index
    %c0_58 = arith.constant 0 : index
    %171 = vector.load %arg2[%c112_57, %c0_58] : memref<288x64xbf16, #tpu.memory_space<vmem>>, vector<16x32xbf16>
    %172 = arith.truncf %170 : vector<8x16xf32> to vector<8x16xbf16>
    %cst_59 = arith.constant dense<0.000000e+00> : vector<8x32xf32>
    %173 = tpu.matmul %172, %171, %cst_59 {dimension_numbers = #tpu.dot_dimension_numbers<[1], [0], [0], [1], [0, 0, 1, 1], [], []>} : vector<8x16xbf16>, vector<16x32xbf16>, vector<8x32xf32> -> vector<8x32xf32>
    %174 = arith.addf %150, %173 : vector<8x32xf32>
    %175 = vector.extract_strided_slice %29 {offsets = [8, 0], sizes = [8, 32], strides = [1, 1]} : vector<16x32xf32> to vector<8x32xf32>
    %176 = arith.addf %175, %174 : vector<8x32xf32>
    %177 = vector.broadcast %49 : vector<1x32xf32> to vector<8x32xf32>
    %178 = arith.addf %176, %177 : vector<8x32xf32>
    %cst_60 = arith.constant dense<0.000000e+00> : vector<8xf32>
    %179 = vector.multi_reduction <add>, %178, %cst_60 [1] : vector<8x32xf32> to vector<8xf32>
    %180 = vector.shape_cast %179 : vector<8xf32> to vector<8x1xf32>
    %cst_61 = arith.constant 3.200000e+01 : f32
    %181 = vector.broadcast %cst_61 : f32 to vector<8x1xf32>
    %182 = arith.divf %180, %181 : vector<8x1xf32>
    %183 = vector.broadcast %182 : vector<8x1xf32> to vector<8x32xf32>
    %184 = arith.subf %178, %183 : vector<8x32xf32>
    %185 = arith.mulf %184, %184 : vector<8x32xf32>
    %cst_62 = arith.constant dense<0.000000e+00> : vector<8xf32>
    %186 = vector.multi_reduction <add>, %185, %cst_62 [1] : vector<8x32xf32> to vector<8xf32>
    %187 = vector.shape_cast %186 : vector<8xf32> to vector<8x1xf32>
    %cst_63 = arith.constant 3.200000e+01 : f32
    %188 = vector.broadcast %cst_63 : f32 to vector<8x1xf32>
    %189 = arith.divf %187, %188 : vector<8x1xf32>
    %190 = vector.broadcast %182 : vector<8x1xf32> to vector<8x32xf32>
    %191 = arith.subf %178, %190 : vector<8x32xf32>
    %cst_64 = arith.constant 9.99999996E-13 : f32
    %192 = vector.broadcast %cst_64 : f32 to vector<8x1xf32>
    %193 = arith.addf %189, %192 : vector<8x1xf32>
    %194 = math.rsqrt %193 : vector<8x1xf32>
    %195 = vector.broadcast %194 : vector<8x1xf32> to vector<8x32xf32>
    %196 = arith.mulf %191, %195 : vector<8x32xf32>
    %197 = vector.broadcast %50 : vector<1x32xf32> to vector<8x32xf32>
    %198 = arith.mulf %196, %197 : vector<8x32xf32>
    %199 = vector.broadcast %51 : vector<1x32xf32> to vector<8x32xf32>
    %200 = arith.addf %198, %199 : vector<8x32xf32>
    %201 = vector.extract_strided_slice %200 {offsets = [0, 0], sizes = [1, 32], strides = [1, 1]} : vector<8x32xf32> to vector<1x32xf32>
    %202 = tpu.concatenate %126, %201 in 0 : vector<1x32xf32>, vector<1x32xf32> -> vector<2x32xf32>
    %203 = arith.truncf %202 : vector<2x32xf32> to vector<2x32xbf16>
    %c128 = arith.constant 128 : index
    %c0_65 = arith.constant 0 : index
    %204 = vector.load %arg2[%c128, %c0_65] : memref<288x64xbf16, #tpu.memory_space<vmem>>, vector<32x64xbf16>
    %cst_66 = arith.constant dense<0.000000e+00> : vector<2x64xf32>
    %205 = tpu.matmul %203, %204, %cst_66 {dimension_numbers = #tpu.dot_dimension_numbers<[1], [0], [0], [1], [0, 0, 1, 1], [], []>} : vector<2x32xbf16>, vector<32x64xbf16>, vector<2x64xf32> -> vector<2x64xf32>
    %c8 = arith.constant 8 : index
    %c0_67 = arith.constant 0 : index
    %206 = vector.load %arg3[%c8, %c0_67] : memref<14x64xf32, #tpu.memory_space<vmem>>, vector<1x64xf32>
    %207 = vector.broadcast %206 : vector<1x64xf32> to vector<2x64xf32>
    %208 = arith.addf %205, %207 : vector<2x64xf32>
    %cst_68 = arith.constant 5.000000e-01 : f32
    %209 = vector.broadcast %cst_68 : f32 to vector<2x64xf32>
    %210 = arith.mulf %209, %208 : vector<2x64xf32>
    %cst_69 = arith.constant 4.471500e-02 : f32
    %211 = vector.broadcast %cst_69 : f32 to vector<2x64xf32>
    %212 = arith.mulf %211, %208 : vector<2x64xf32>
    %213 = arith.mulf %212, %208 : vector<2x64xf32>
    %214 = arith.mulf %213, %208 : vector<2x64xf32>
    %215 = arith.addf %208, %214 : vector<2x64xf32>
    %cst_70 = arith.constant 0.797884583 : f32
    %216 = vector.broadcast %cst_70 : f32 to vector<2x64xf32>
    %217 = arith.mulf %216, %215 : vector<2x64xf32>
    %218 = math.tanh %217 : vector<2x64xf32>
    %cst_71 = arith.constant 1.000000e+00 : f32
    %219 = vector.broadcast %cst_71 : f32 to vector<2x64xf32>
    %220 = arith.addf %219, %218 : vector<2x64xf32>
    %221 = arith.mulf %210, %220 : vector<2x64xf32>
    %222 = arith.truncf %221 : vector<2x64xf32> to vector<2x64xbf16>
    %c160 = arith.constant 160 : index
    %c0_72 = arith.constant 0 : index
    %223 = vector.load %arg2[%c160, %c0_72] : memref<288x64xbf16, #tpu.memory_space<vmem>>, vector<64x32xbf16>
    %cst_73 = arith.constant dense<0.000000e+00> : vector<2x32xf32>
    %224 = tpu.matmul %222, %223, %cst_73 {dimension_numbers = #tpu.dot_dimension_numbers<[1], [0], [0], [1], [0, 0, 1, 1], [], []>} : vector<2x64xbf16>, vector<64x32xbf16>, vector<2x32xf32> -> vector<2x32xf32>
    %c9 = arith.constant 9 : index
    %c0_74 = arith.constant 0 : index
    %225 = vector.load %arg3[%c9, %c0_74] : memref<14x64xf32, #tpu.memory_space<vmem>>, vector<1x32xf32>
    %226 = vector.broadcast %225 : vector<1x32xf32> to vector<2x32xf32>
    %227 = arith.addf %224, %226 : vector<2x32xf32>
    %228 = arith.addf %202, %227 : vector<2x32xf32>
    %c10 = arith.constant 10 : index
    %c0_75 = arith.constant 0 : index
    %229 = vector.load %arg3[%c10, %c0_75] : memref<14x64xf32, #tpu.memory_space<vmem>>, vector<1x32xf32>
    %c11 = arith.constant 11 : index
    %c0_76 = arith.constant 0 : index
    %230 = vector.load %arg3[%c11, %c0_76] : memref<14x64xf32, #tpu.memory_space<vmem>>, vector<1x32xf32>
    %cst_77 = arith.constant dense<0.000000e+00> : vector<2xf32>
    %231 = vector.multi_reduction <add>, %228, %cst_77 [1] : vector<2x32xf32> to vector<2xf32>
    %232 = vector.shape_cast %231 : vector<2xf32> to vector<2x1xf32>
    %cst_78 = arith.constant 3.200000e+01 : f32
    %233 = vector.broadcast %cst_78 : f32 to vector<2x1xf32>
    %234 = arith.divf %232, %233 : vector<2x1xf32>
    %235 = vector.broadcast %234 : vector<2x1xf32> to vector<2x32xf32>
    %236 = arith.subf %228, %235 : vector<2x32xf32>
    %237 = arith.mulf %236, %236 : vector<2x32xf32>
    %cst_79 = arith.constant dense<0.000000e+00> : vector<2xf32>
    %238 = vector.multi_reduction <add>, %237, %cst_79 [1] : vector<2x32xf32> to vector<2xf32>
    %239 = vector.shape_cast %238 : vector<2xf32> to vector<2x1xf32>
    %cst_80 = arith.constant 3.200000e+01 : f32
    %240 = vector.broadcast %cst_80 : f32 to vector<2x1xf32>
    %241 = arith.divf %239, %240 : vector<2x1xf32>
    %242 = vector.broadcast %234 : vector<2x1xf32> to vector<2x32xf32>
    %243 = arith.subf %228, %242 : vector<2x32xf32>
    %cst_81 = arith.constant 9.99999996E-13 : f32
    %244 = vector.broadcast %cst_81 : f32 to vector<2x1xf32>
    %245 = arith.addf %241, %244 : vector<2x1xf32>
    %246 = math.rsqrt %245 : vector<2x1xf32>
    %247 = vector.broadcast %246 : vector<2x1xf32> to vector<2x32xf32>
    %248 = arith.mulf %243, %247 : vector<2x32xf32>
    %249 = vector.broadcast %229 : vector<1x32xf32> to vector<2x32xf32>
    %250 = arith.mulf %248, %249 : vector<2x32xf32>
    %251 = vector.broadcast %230 : vector<1x32xf32> to vector<2x32xf32>
    %252 = arith.addf %250, %251 : vector<2x32xf32>
    %253 = arith.truncf %252 : vector<2x32xf32> to vector<2x32xbf16>
    %c224 = arith.constant 224 : index
    %c0_82 = arith.constant 0 : index
    %254 = vector.load %arg2[%c224, %c0_82] : memref<288x64xbf16, #tpu.memory_space<vmem>>, vector<32x32xbf16>
    %cst_83 = arith.constant dense<0.000000e+00> : vector<2x32xf32>
    %255 = tpu.matmul %253, %254, %cst_83 {dimension_numbers = #tpu.dot_dimension_numbers<[1], [0], [0], [1], [0, 0, 1, 1], [], []>} : vector<2x32xbf16>, vector<32x32xbf16>, vector<2x32xf32> -> vector<2x32xf32>
    %c12 = arith.constant 12 : index
    %c0_84 = arith.constant 0 : index
    %256 = vector.load %arg3[%c12, %c0_84] : memref<14x64xf32, #tpu.memory_space<vmem>>, vector<1x32xf32>
    %257 = vector.broadcast %256 : vector<1x32xf32> to vector<2x32xf32>
    %258 = arith.addf %255, %257 : vector<2x32xf32>
    %259 = math.tanh %258 : vector<2x32xf32>
    %260 = arith.truncf %259 : vector<2x32xf32> to vector<2x32xbf16>
    %c256 = arith.constant 256 : index
    %c0_85 = arith.constant 0 : index
    %261 = vector.load %arg2[%c256, %c0_85] : memref<288x64xbf16, #tpu.memory_space<vmem>>, vector<32x2xbf16>
    %cst_86 = arith.constant dense<0.000000e+00> : vector<2x2xf32>
    %262 = tpu.matmul %260, %261, %cst_86 {dimension_numbers = #tpu.dot_dimension_numbers<[1], [0], [0], [1], [0, 0, 1, 1], [], []>} : vector<2x32xbf16>, vector<32x2xbf16>, vector<2x2xf32> -> vector<2x2xf32>
    %c13 = arith.constant 13 : index
    %c0_87 = arith.constant 0 : index
    %263 = vector.load %arg3[%c13, %c0_87] : memref<14x64xf32, #tpu.memory_space<vmem>>, vector<1x2xf32>
    %264 = vector.broadcast %263 : vector<1x2xf32> to vector<2x2xf32>
    %265 = arith.addf %262, %264 : vector<2x2xf32>
    %c0_88 = arith.constant 0 : index
    %c0_89 = arith.constant 0 : index
    %266 = vector.load %arg4[%c0_88, %c0_89] : memref<2x2xf32, #tpu.memory_space<vmem>>, vector<2x2xf32>
    tpu.vector_store %arg4[%c0_88, %c0_89], %265 {strides = array<i32>} : memref<2x2xf32, #tpu.memory_space<vmem>>, vector<2x2xf32>,
    return
  }
}

</mosaic_0001>

<bundles_post_ra>
// kernel: bert_classifier_forward.1
= control target key start
LH: loop header
LB: loop body
LE: loop exit
PB: predicated region body
PF: predicated region fallthrough
CT: control target
= control target key end

     0   :  { %vm26_vm0 = vcmask 261120   ;;  %s1884_s0 = inlined_call_operand.vmem [shape: f32[16,32], index: 0, kind: input, shape index: {}]   ;;  %s1885_s1 = inlined_call_operand.vmem [shape: f32[2,8], index: 1, kind: input, shape index: {}]   ;;  %s1886_s2 = inlined_call_operand.vmem [shape: bf16[288,64], index: 2, kind: input, shape index: {}]   ;;  %s1887_s3 = inlined_call_operand.vmem [shape: f32[14,64], index: 3, kind: input, shape index: {}]   ;;  %s1888_s4 = inlined_call_operand.hbm [shape: f32[2,2], index: 4, kind: output, shape index: {}]  }
   0x1   :  { %v19_v0 = vld [vmem:[%s1884_s0] sm:$0xff]  ;;  %v20_v1 = vld [vmem:[%s1884_s0 + $0x8] sm:$0xff] }
   0x2   :  { %v27_v2 = vsel %vm26_vm0, %v19_v0, 0.0  ;;  %v30_v3 = vsel %vm26_vm0, %v20_v1, 0.0 }
   0x3   :  { %28 = vadd.xlane.f32.xlu0 %v27_v2 }
   0x7   :  { %31 = vadd.xlane.f32.xlu0 %v30_v3 }
   0x8   :  { %9 = vsyncpa [#allocation3], 0  ;;  %v1522_v14 = vld [vmem:[%s1886_s2 + $0x8] sm:$0xff]   ;;  %v1523_v15 = vld [vmem:[%s1886_s2 + $0x18] sm:$0xff]   ;;  %v1592_v16 = vmov 0.0   ;;  %vm1593_vm1 = vmmov 0   ;;  %v310_v3 = vlaneseq }
   0x9   :  { %1386 = vmatprep.subr.bf16.mxu0 %v1592_v16  ;;  %1394 = vmatprep.subr.bf16.mxu1 %v1592_v16  ;;  %v1524_v17 = vld [vmem:[%s1886_s2] sm:$0xff]   ;;  %v1525_v18 = vld [vmem:[%s1886_s2 + $0x10] sm:$0xff]   ;;  %v1526_v35 = vld [vmem:[%s1886_s2 + $0x28] sm:$0xff]   ;;  %vm262_vm2 = vcmask 130048   ;;  %s1594_s12 = smov 112   ;;  %vm331_vm3 = vcmask 1043456  }
   0xa   :  { %1387 = vmatpush3.bf16.msra.mxu0 %v1522_v14  ;;  %1395 = vmatpush3.bf16.msra.mxu1 %v1523_v15  ;;  %v1288_v27 = vld [vmem:[%s1887_s3] ss:$0 sm:$0xff]  ;;  %v1289_v31 = vld [vmem:[%s1887_s3 + $0x1] ss:$0 sm:$0xff]  ;;  %v1290_v40 = vld [vmem:[%s1887_s3 + $0x2] ss:$0 sm:$0xff] }
   0xb   :  { %1388 = vmatprep.subr.bf16.mxu0 %v1592_v16  ;;  %1396 = vmatprep.subr.bf16.mxu1 %v1592_v16  ;;  %v1527_v37 = vld [vmem:[%s1886_s2 + $0x20] sm:$0xff]   ;;  %vm315_vm4 = vcmask 64512   ;;  %vm956_vm5 = vcmask 1040384   ;;  %vm1070_vm6 = vcmask 523264   ;;  %vm1117_vm7 = vcmask 254976  }
   0xc   :  { %1390 = vmatprep.mubr.msk.bf16.mxu0 %vm1593_vm1, %v1592_v16  ;;  %1398 = vmatprep.mubr.msk.bf16.mxu1 %vm1593_vm1, %v1592_v16  ;;  %v1294_v41 = vld [vmem:[%s1887_s3 + $0x3] ss:$0 sm:$0xff]  ;;  %v1298_v56 = vld [vmem:[%s1887_s3 + $0x4] ss:$0 sm:$0xff]  ;;  %vm1272_vm8 = vcmask 9216  }
   0xe   :  { %1389 = vmatpush3.bf16.msra.mxu0 %v1524_v17  ;;  %1397 = vmatpush3.bf16.msra.mxu1 %v1525_v18 }
   0xf   :  { %1402 = vmatprep.subr.bf16.mxu0 %v1592_v16  ;;  %1410 = vmatprep.subr.bf16.mxu1 %v1592_v16 }
  0x8c   :  { %v29_v4 = vpop.xlane.xlu0 %28 }
  0x8d   :  { %v34_v5 = vmul.f32 0.03125, %v29_v4  ;;  %v21_v4 = vld [vmem:[%s1885_s1] sm:$0x3] }
  0x8f   :  { %v36_v6 = vsub.f32 %v19_v0, %v34_v5  ;;  %v22_v5 = vsub.f32 1.0, %v21_v4 }
  0x90   :  { %v32_v7 = vpop.xlane.xlu0 %31 }
  0x91   :  { %v35_v8 = vmul.f32 0.03125, %v32_v7  ;;  %v38_v9 = vmul.f32 %v36_v6, %v36_v6  ;;  %v1721_v7 = vmul.f32 -1e+09, %v22_v5 }
  0x93   :  { %v37_v10 = vsub.f32 %v20_v1, %v35_v8  ;;  %v40_v11 = vsel %vm26_vm0, %v38_v9, 0.0 }
  0x94   :  { %41 = vadd.xlane.f32.xlu1 %v40_v11 }
  0x95   :  { %v39_v12 = vmul.f32 %v37_v10, %v37_v10 }
  0x97   :  { %v43_v13 = vsel %vm26_vm0, %v39_v12, 0.0 }
  0x98   :  { %44 = vadd.xlane.f32.xlu1 %v43_v13 }
 0x11d   :  { %v42_v19 = vpop.xlane.xlu1 %41 }
 0x11e   :  { %v46_v20 = vmul.f32 0.03125, %v42_v19 }
 0x120   :  { %v48_v21 = vadd.f32 1e-12, %v46_v20 }
 0x121   :  { %v45_v22 = vpop.xlane.xlu1 %44 }
 0x122   :  { %1540 = vrsqrt.f32 %v48_v21  ;;  %v47_v23 = vmul.f32 0.03125, %v45_v22 }
 0x124   :  { %v49_v24 = vadd.f32 1e-12, %v47_v23 }
 0x126   :  { %1542 = vrsqrt.f32 %v49_v24 }
 0x12f   :  { %v1541_v25 = vpop.eup %1540 }
 0x130   :  { %v52_v26 = vmul.f32 %v1541_v25, %v36_v6  ;;  %v1719_v6 = vshrl.u32 %v310_v3, 7 }
 0x132   :  { %v58_v30 = vmul.f32 %v1288_v27, %v52_v26  ;;  %v312_v8 = vsub.s32 0, %v1719_v6 }
 0x133   :  { %v1543_v28 = vpop.eup %1542 }
 0x134   :  { %v53_v29 = vmul.f32 %v1543_v28, %v37_v10  ;;  %v1659_v33 = vadd.f32 %v1289_v31, %v58_v30  ;;  %v313_v9 = vrot.slane %v1721_v7, %v312_v8 }
 0x136   :  { %v59_v32 = vmul.f32 %v1288_v27, %v53_v29 }
 0x138   :  { %v1661_v34 = vadd.f32 %v1289_v31, %v59_v32 }
 0x13a   :  { %v66_v36 = vpack.c.bf16 %v1661_v34, %v1659_v33 }
 0x13c   :  { %1391 = vmatmul.mubr.msk.bf16.vlgmr.msra.gmra.mxu0 %vm26_vm0, %v66_v36  ;;  %1399 = vmatmul.mubr.msk.bf16.vlgmr.msra.gmra.mxu1 %vm26_vm0, %v66_v36 }
 0x13d   :  { %1403 = vmatpush3.bf16.msra.mxu0 %v1526_v35  ;;  %1406 = vmatprep.mubr.msk.bf16.mxu0 %vm1593_vm1, %v1592_v16 }
 0x13e   :  { %1404 = vmatprep.subr.bf16.mxu0 %v1592_v16  ;;  %1412 = vmatprep.mubr.msk.bf16.mxu1 %vm1593_vm1, %v1592_v16 }
 0x141   :  { %1405 = vmatpush3.bf16.msra.mxu0 %v1527_v37 }
 0x142   :  { %1416 = vmatprep.subr.bf16.mxu0 %v1592_v16 }
 0x144   :  { %1407 = vmatmul.mubr.msk.bf16.vlgmr.msra.gmra.mxu0 %vm26_vm0, %v66_v36 }
 0x145   :  { %1418 = vmatprep.mubr.msk.bf16.mxu0 %vm1593_vm1, %v1592_v16 }
 0x1fc   :  { %v125_v38 = vpop.f32.mrf.mxu0  ;;  %v187_v39 = vpop.f32.mrf.mxu1 }
 0x1fd   :  { %v126_v46 = vadd.f32 %v1290_v40, %v125_v38  ;;  %v188_v47 = vadd.f32 %v1294_v41, %v187_v39 }
 0x1fe   :  { %v1392_v42 = vpop.f32.mrf.mxu0  ;;  %v1400_v43 = vpop.f32.mrf.mxu1 }
 0x200   :  { %v128_v44 = vpop.f32.mrf.mxu0  ;;  %v190_v45 = vpop.f32.mrf.mxu1 }
 0x201   :  { %v129_v48 = vadd.f32 %v1290_v40, %v128_v44  ;;  %v191_v49 = vadd.f32 %v1294_v41, %v190_v45  ;;  %v1529_v45 = vld [vmem:[%s1886_s2 + $0x38] sm:$0xff]  }
 0x202   :  { %v1393_v50 = vpop.f32.mrf.mxu0  ;;  %v1401_v51 = vpop.f32.mrf.mxu1 }
 0x203   :  { %v1688_v52 = vpack.c.bf16 %v129_v48, %v126_v46  ;;  %v1690_v53 = vpack.c.bf16 %v191_v49, %v188_v47  ;;  %v1747_v49 = vld [vmem:[%s1886_s2 + $0x30] sm:$0xff]  }
 0x204   :  { %v249_v54 = vpop.f32.mrf.mxu0 }
 0x205   :  { %382 = vrot.lane.b32.xlu0 %v1690_v53, %s1594_s12  ;;  %379 = vrot.lane.b32.xlu1 %v1688_v52, %s1594_s12  ;;  %v267_v55 = vsel %vm262_vm2, %v1690_v53, 0  ;;  %v250_v59 = vadd.f32 %v1298_v56, %v249_v54  ;;  %v624_v37 = vrot.slane %v1690_v53, 4  ;;  %v623_v38 = vrot.slane %v1688_v52, 4 }
 0x206   :  { %v1408_v57 = vpop.f32.mrf.mxu0  ;;  %1411 = vmatpush3.bf16.xpose.msra.mxu1 %v267_v55 }
 0x207   :  { %1422 = vmatprep.subr.bf16.mxu1 %v1592_v16 }
 0x208   :  { %v252_v58 = vpop.f32.mrf.mxu0 }
 0x209   :  { %v253_v60 = vadd.f32 %v1298_v56, %v252_v58 }
 0x20a   :  { %v1409_v61 = vpop.f32.mrf.mxu0 }
 0x20b   :  { %v1702_v62 = vpack.c.bf16 %v253_v60, %v250_v59  ;;  %v629_v61 = vsel %vm262_vm2, %v624_v37, 0 }
 0x20d   :  { %1413 = vmatmul.mubr.msk.bf16.vlgmr.msra.gmra.mxu1 %vm262_vm2, %v1688_v52  ;;  %v333_v63 = vsel %vm331_vm3, %v1702_v62, 0  ;;  %v689_v51 = vrot.slane %v1702_v62, 4 }
 0x20e   :  { %1417 = vmatpush3.bf16.msra.mxu0 %v333_v63  ;;  %1424 = vmatprep.mubr.msk.bf16.mxu1 %vm1593_vm1, %v1592_v16 }
 0x20f   :  { %1428 = vmatprep.subr.bf16.mxu0 %v1592_v16  ;;  %v694_v55 = vsel %vm331_vm3, %v689_v51, 0 }
 0x277   :  { %v383_v0 = vpop.permute.xlu0 %382  ;;  %v380_v2 = vpop.permute.xlu1 %379 }
 0x278   :  { %v388_v1 = vsel %vm262_vm2, %v383_v0, 0 }
 0x279   :  { %1423 = vmatpush3.bf16.xpose.msra.mxu1 %v388_v1 }
 0x27a   :  { %1434 = vmatprep.subr.bf16.mxu1 %v1592_v16 }
 0x280   :  { %1425 = vmatmul.mubr.msk.bf16.vlgmr.msra.gmra.mxu1 %vm262_vm2, %v380_v2 }
 0x281   :  { %1436 = vmatprep.mubr.msk.bf16.mxu1 %vm1593_vm1, %v1592_v16  ;;  %1435 = vmatpush3.bf16.msra.mxu1 %v1529_v45 }
 0x282   :  { %1446 = vmatprep.subr.bf16.mxu1 %v1592_v16 }
 0x2cd   :  { %v303_v10 = vpop.f32.mrf.mxu1 }
 0x2ce   :  { %v309_v11 = vmul.f32 0.25, %v303_v10 }
 0x2cf   :  { %v1414_v12 = vpop.f32.mrf.mxu1 }
 0x2d0   :  { %v314_v13 = vadd.f32 %v313_v9, %v309_v11  ;;  %v674_v11 = vsub.s32 1, %v1719_v6 }
 0x2d1   :  { %v306_v14 = vpop.f32.mrf.mxu1 }
 0x2d2   :  { %v316_v15 = vsel %vm315_vm4, %v314_v13, -inf  ;;  %v675_v14 = vrot.slane %v1721_v7, %v674_v11  ;;  %v1310_v11 = vld [vmem:[%s1887_s3 + $0x5] ss:$0 sm:$0xff] }
 0x2d3   :  { %317 = vmax.xlane.f32.xlu1 %v316_v15  ;;  %v1415_v17 = vpop.f32.mrf.mxu1 }
 0x340   :  { %v424_v18 = vpop.f32.mrf.mxu1 }
 0x341   :  { %v430_v19 = vmul.f32 0.25, %v424_v18 }
 0x342   :  { %v1426_v20 = vpop.f32.mrf.mxu1 }
 0x343   :  { %v431_v21 = vadd.f32 %v430_v19, %v313_v9 }
 0x344   :  { %v427_v22 = vpop.f32.mrf.mxu1 }
 0x345   :  { %v432_v23 = vsel %vm315_vm4, %v431_v21, -inf }
 0x346   :  { %433 = vmax.xlane.f32.xlu0 %v432_v23  ;;  %v1427_v24 = vpop.f32.mrf.mxu1 }
 0x35c   :  { %v318_v25 = vpop.xlane.xlu1 %317 }
 0x35d   :  { %v319_v26 = vsub.f32 %v314_v13, %v318_v25 }
 0x35f   :  { %v320_v27 = vmul.f32 1.442695, %v319_v26 }
 0x361   :  { %1544 = vpow2.f32 %v320_v27 }
 0x36e   :  { %v1545_v28 = vpop.eup %1544 }
 0x36f   :  { %v322_v29 = vsel %vm315_vm4, %v1545_v28, 0.0 }
 0x370   :  { %323 = vadd.xlane.f32.xlu0 %v322_v29 }
 0x386   :  { %445 = vrot.lane.b32.xlu0 %v1702_v62, %s1594_s12 }
 0x3cf   :  { %v434_v30 = vpop.xlane.xlu0 %433 }
 0x3d0   :  { %v435_v31 = vsub.f32 %v431_v21, %v434_v30 }
 0x3d2   :  { %v436_v32 = vmul.f32 1.442695, %v435_v31 }
 0x3d4   :  { %1546 = vpow2.f32 %v436_v32 }
 0x3e1   :  { %v1547_v35 = vpop.eup %1546 }
 0x3e2   :  { %v438_v36 = vsel %vm315_vm4, %v1547_v35, 0.0 }
 0x3e3   :  { %439 = vadd.xlane.f32.xlu1 %v438_v36 }
 0x3f4   :  { %739 = vrot.lane.b32.xlu1 %v624_v37, %s1594_s12 }
 0x3f8   :  { %737 = vrot.lane.b32.xlu1 %v623_v38, %s1594_s12 }
 0x3f9   :  { %v324_v39 = vpop.xlane.xlu0 %323 }
 0x3fa   :  { %1548 = vrcp.f32 %v324_v39 }
 0x3fd   :  { %v446_v42 = vpop.permute.xlu0 %445 }
 0x3fe   :  { %v451_v44 = vsel %vm331_vm3, %v446_v42, 0 }
 0x407   :  { %v1549_v40 = vpop.eup %1548 }
 0x408   :  { %v326_v41 = vmul.f32 %v1549_v40, %v1545_v28 }
 0x40a   :  { %v327_v43 = vpack.c.bf16 %v326_v41, %v326_v41 }
 0x40c   :  { %1419 = vmatmul.mubr.msk.bf16.vlgmr.msra.gmra.mxu0 %vm315_vm4, %v327_v43 }
 0x40d   :  { %1429 = vmatpush3.bf16.msra.mxu0 %v451_v44  ;;  %1430 = vmatprep.mubr.msk.bf16.mxu0 %vm1593_vm1, %v1592_v16 }
 0x40e   :  { %1440 = vmatprep.subr.bf16.mxu0 %v1592_v16 }
 0x46c   :  { %v440_v46 = vpop.xlane.xlu1 %439 }
 0x46d   :  { %1550 = vrcp.f32 %v440_v46 }
 0x470   :  { %v740_v0 = vpop.permute.xlu1 %739 }
 0x471   :  { %v745_v1 = vsel %vm262_vm2, %v740_v0, 0 }
 0x474   :  { %v738_v2 = vpop.permute.xlu1 %737 }
 0x47a   :  { %v1551_v47 = vpop.eup %1550 }
 0x47b   :  { %v442_v48 = vmul.f32 %v1551_v47, %v1547_v35 }
 0x47d   :  { %v443_v50 = vpack.c.bf16 %v442_v48, %v442_v48 }
 0x47f   :  { %1431 = vmatmul.mubr.msk.bf16.vlgmr.msra.gmra.mxu0 %vm315_vm4, %v443_v50 }
 0x480   :  { %1441 = vmatpush3.bf16.msra.mxu0 %v1747_v49  ;;  %1442 = vmatprep.mubr.msk.bf16.mxu0 %vm1593_vm1, %v1592_v16 }
 0x481   :  { %1452 = vmatprep.subr.bf16.mxu0 %v1592_v16 }
 0x4cc   :  { %v369_v52 = vpop.f32.mrf.mxu0 }
 0x4cd   :  { %v377_v53 = vpack.c.bf16 %v369_v52, %v369_v52 }
 0x4ce   :  { %v1420_v54 = vpop.f32.mrf.mxu0 }
 0x4cf   :  { %1443 = vmatmul.mubr.msk.bf16.vlgmr.msra.gmra.mxu0 %vm262_vm2, %v377_v53 }
 0x4d0   :  { %1453 = vmatpush3.bf16.msra.mxu0 %v694_v55  ;;  %v372_v56 = vpop.f32.mrf.mxu0  ;;  %1454 = vmatprep.mubr.msk.bf16.mxu0 %vm1593_vm1, %v1592_v16 }
 0x4d1   :  { %1464 = vmatprep.subr.bf16.mxu0 %v1592_v16 }
 0x4d2   :  { %v1421_v57 = vpop.f32.mrf.mxu0 }
 0x53f   :  { %v487_v58 = vpop.f32.mrf.mxu0 }
 0x540   :  { %v495_v59 = vpack.c.bf16 %v487_v58, %v487_v58 }
 0x541   :  { %v1432_v60 = vpop.f32.mrf.mxu0 }
 0x542   :  { %1437 = vmatmul.mubr.msk.bf16.vlgmr.msra.gmra.mxu1 %vm262_vm2, %v495_v59 }
 0x543   :  { %1447 = vmatpush3.bf16.xpose.msra.mxu1 %v629_v61  ;;  %v490_v62 = vpop.f32.mrf.mxu0  ;;  %1448 = vmatprep.mubr.msk.bf16.mxu1 %vm1593_vm1, %v1592_v16 }
 0x544   :  { %1458 = vmatprep.subr.bf16.mxu1 %v1592_v16 }
 0x545   :  { %v1433_v63 = vpop.f32.mrf.mxu0 }
 0x54a   :  { %1449 = vmatmul.mubr.msk.bf16.vlgmr.msra.gmra.mxu1 %vm262_vm2, %v623_v38 }
 0x54b   :  { %1459 = vmatpush3.bf16.xpose.msra.mxu1 %v745_v1  ;;  %1460 = vmatprep.mubr.msk.bf16.mxu1 %vm1593_vm1, %v1592_v16 }
 0x54c   :  { %1470 = vmatprep.subr.bf16.mxu1 %v1592_v16 }
 0x552   :  { %1461 = vmatmul.mubr.msk.bf16.vlgmr.msra.gmra.mxu1 %vm262_vm2, %v738_v2 }
 0x553   :  { %1471 = vmatpush3.bf16.msra.mxu1 %v1529_v45  ;;  %1472 = vmatprep.mubr.msk.bf16.mxu1 %vm1593_vm1, %v1592_v16 }
 0x554   :  { %1482 = vmatprep.subr.bf16.mxu1 %v1592_v16 }
 0x58f   :  { %v1774_v3 = vpop.f32.mrf.mxu0 }
 0x591   :  { %v1444_v4 = vpop.f32.mrf.mxu0 }
 0x593   :  { %v591_v5 = vpop.f32.mrf.mxu0 }
 0x595   :  { %v1445_v8 = vpop.f32.mrf.mxu0 }
 0x602   :  { %v1776_v9 = vpop.f32.mrf.mxu1 }
 0x603   :  { %v589_v0 = vadd.f32 %v1774_v3, %v1776_v9 }
 0x604   :  { %v1438_v10 = vpop.f32.mrf.mxu1 }
 0x605   :  { %v594_v5 = vadd.f32 %v589_v0, %v1659_v33 }
 0x606   :  { %v542_v12 = vpop.f32.mrf.mxu1 }
 0x608   :  { %v1439_v13 = vpop.f32.mrf.mxu1 }
 0x60a   :  { %v665_v15 = vpop.f32.mrf.mxu1 }
 0x60b   :  { %v671_v17 = vmul.f32 0.25, %v665_v15  ;;  %v599_v15 = vadd.f32 %v1310_v11, %v594_v5 }
 0x60c   :  { %v1450_v18 = vpop.f32.mrf.mxu1 }
 0x60d   :  { %v676_v19 = vadd.f32 %v675_v14, %v671_v17  ;;  %v600_v3 = vsel %vm26_vm0, %v599_v15, 0.0 }
 0x60e   :  { %v668_v20 = vpop.f32.mrf.mxu1 }
 0x60f   :  { %v677_v21 = vsel %vm315_vm4, %v676_v19, -inf }
 0x610   :  { %678 = vmax.xlane.f32.xlu1 %v677_v21  ;;  %v1451_v22 = vpop.f32.mrf.mxu1 }
 0x612   :  { %v781_v23 = vpop.f32.mrf.mxu1 }
 0x613   :  { %v787_v24 = vmul.f32 0.25, %v781_v23 }
 0x614   :  { %v1462_v25 = vpop.f32.mrf.mxu1 }
 0x615   :  { %v788_v26 = vadd.f32 %v787_v24, %v675_v14  ;;  %v1530_v24 = vld [vmem:[%s1886_s2 + $0x48] sm:$0xff]   ;;  %v1531_v25 = vld [vmem:[%s1886_s2 + $0x40] sm:$0xff]  }
 0x616   :  { %v784_v27 = vpop.f32.mrf.mxu1 }
 0x617   :  { %v789_v6 = vsel %vm315_vm4, %v788_v26, -inf }
 0x618   :  { %790 = vmax.xlane.f32.xlu0 %v789_v6  ;;  %v1463_v28 = vpop.f32.mrf.mxu1 }
 0x621   :  { %801 = vrot.lane.b32.xlu1 %v689_v51, %s1594_s12 }
 0x699   :  { %v679_v7 = vpop.xlane.xlu1 %678 }
 0x69a   :  { %v680_v29 = vsub.f32 %v676_v19, %v679_v7 }
 0x69c   :  { %v681_v30 = vmul.f32 1.442695, %v680_v29 }
 0x69d   :  { %v802_v44 = vpop.permute.xlu1 %801 }
 0x69e   :  { %1552 = vpow2.f32 %v681_v30  ;;  %v807_v46 = vsel %vm331_vm3, %v802_v44, 0 }
 0x6a1   :  { %v791_v31 = vpop.xlane.xlu0 %790 }
 0x6a2   :  { %v792_v32 = vsub.f32 %v788_v26, %v791_v31  ;;  %v1311_v31 = vld [vmem:[%s1887_s3 + $0x6] ss:$0 sm:$0xff] }
 0x6a4   :  { %v793_v35 = vmul.f32 1.442695, %v792_v32 }
 0x6a6   :  { %1554 = vpow2.f32 %v793_v35  ;;  %v1312_v35 = vld [vmem:[%s1887_s3 + $0x7] ss:$0 sm:$0xff] }
 0x6ab   :  { %v1553_v36 = vpop.eup %1552 }
 0x6ac   :  { %v683_v37 = vsel %vm315_vm4, %v1553_v36, 0.0 }
 0x6ad   :  { %684 = vadd.xlane.f32.xlu0 %v683_v37 }
 0x6b3   :  { %v1555_v38 = vpop.eup %1554 }
 0x6b4   :  { %v795_v39 = vsel %vm315_vm4, %v1555_v38, 0.0 }
 0x6b5   :  { %796 = vadd.xlane.f32.xlu0 %v795_v39 }
 0x736   :  { %v685_v40 = vpop.xlane.xlu0 %684 }
 0x737   :  { %1556 = vrcp.f32 %v685_v40 }
 0x73e   :  { %v797_v41 = vpop.xlane.xlu0 %796 }
 0x73f   :  { %1558 = vrcp.f32 %v797_v41 }
 0x744   :  { %v1557_v42 = vpop.eup %1556 }
 0x745   :  { %v687_v43 = vmul.f32 %v1557_v42, %v1553_v36 }
 0x747   :  { %v688_v45 = vpack.c.bf16 %v687_v43, %v687_v43 }
 0x749   :  { %1455 = vmatmul.mubr.msk.bf16.vlgmr.msra.gmra.mxu0 %vm315_vm4, %v688_v45  ;;  %v1532_v45 = vld [vmem:[%s1886_s2 + $0x68] sm:$0xff]  }
 0x74a   :  { %1465 = vmatpush3.bf16.msra.mxu0 %v807_v46  ;;  %1466 = vmatprep.mubr.msk.bf16.mxu0 %vm1593_vm1, %v1592_v16  ;;  %v1533_v46 = vld [vmem:[%s1886_s2 + $0x60] sm:$0xff]  }
 0x74b   :  { %1476 = vmatprep.subr.bf16.mxu0 %v1592_v16 }
 0x74c   :  { %v1559_v47 = vpop.eup %1558 }
 0x74d   :  { %v799_v48 = vmul.f32 %v1559_v47, %v1555_v38  ;;  %v1534_v47 = vld [vmem:[%s1886_s2 + $0x58] sm:$0xff]  }
 0x74f   :  { %v800_v50 = vpack.c.bf16 %v799_v48, %v799_v48  ;;  %v1535_v48 = vld [vmem:[%s1886_s2 + $0x50] sm:$0xff]  }
 0x751   :  { %1467 = vmatmul.mubr.msk.bf16.vlgmr.msra.gmra.mxu0 %vm315_vm4, %v800_v50  ;;  %v1319_v50 = vld [vmem:[%s1887_s3 + $0x8] ss:$0 sm:$0xff] }
 0x752   :  { %1477 = vmatpush3.bf16.msra.mxu0 %v1747_v49  ;;  %1478 = vmatprep.mubr.msk.bf16.mxu0 %vm1593_vm1, %v1592_v16 }
 0x753   :  { %1490 = vmatprep.subr.bf16.mxu0 %v1592_v16 }
 0x809   :  { %v730_v51 = vpop.f32.mrf.mxu0 }
 0x80a   :  { %v736_v52 = vpack.c.bf16 %v730_v51, %v730_v51 }
 0x80b   :  { %v1456_v53 = vpop.f32.mrf.mxu0 }
 0x80c   :  { %1479 = vmatmul.mubr.msk.bf16.vlgmr.msra.gmra.mxu0 %vm262_vm2, %v736_v52 }
 0x80d   :  { %v733_v54 = vpop.f32.mrf.mxu0  ;;  %1498 = vmatprep.mubr.msk.bf16.mxu0 %vm1593_vm1, %v1592_v16  ;;  %1491 = vmatpush3.bf16.msra.mxu0 %v1532_v45 }
 0x80e   :  { %1492 = vmatprep.subr.bf16.mxu0 %v1592_v16 }
 0x80f   :  { %v1457_v55 = vpop.f32.mrf.mxu0 }
 0x811   :  { %v843_v56 = vpop.f32.mrf.mxu0  ;;  %1493 = vmatpush3.bf16.msra.mxu0 %v1533_v46 }
 0x812   :  { %v849_v57 = vpack.c.bf16 %v843_v56, %v843_v56  ;;  %1494 = vmatprep.subr.bf16.mxu0 %v1592_v16 }
 0x813   :  { %v1468_v58 = vpop.f32.mrf.mxu0 }
 0x814   :  { %1473 = vmatmul.mubr.msk.bf16.vlgmr.msra.gmra.mxu1 %vm262_vm2, %v849_v57 }
 0x815   :  { %v846_v49 = vpop.f32.mrf.mxu0  ;;  %1486 = vmatprep.mubr.msk.bf16.mxu1 %vm1593_vm1, %v1592_v16  ;;  %1483 = vmatpush3.bf16.msra.mxu1 %v1530_v24 }
 0x816   :  { %1484 = vmatprep.subr.bf16.mxu1 %v1592_v16  ;;  %1495 = vmatpush3.bf16.msra.mxu0 %v1534_v47 }
 0x817   :  { %v1469_v59 = vpop.f32.mrf.mxu0  ;;  %1496 = vmatprep.subr.bf16.mxu0 %v1592_v16 }
 0x819   :  { %1485 = vmatpush3.bf16.msra.mxu1 %v1531_v25 }
 0x81a   :  { %1502 = vmatprep.subr.bf16.mxu1 %v1592_v16  ;;  %1497 = vmatpush3.bf16.msra.mxu0 %v1535_v48 }
 0x8cc   :  { %v930_v60 = vpop.f32.mrf.mxu0 }
 0x8ce   :  { %v1480_v61 = vpop.f32.mrf.mxu0 }
 0x8d0   :  { %v933_v62 = vpop.f32.mrf.mxu0 }
 0x8d2   :  { %v1481_v63 = vpop.f32.mrf.mxu0 }
 0x8d4   :  { %v887_v1 = vpop.f32.mrf.mxu1 }
 0x8d5   :  { %v931_v2 = vadd.f32 %v930_v60, %v887_v1  ;;  %v1323_v1 = vld [vmem:[%s1887_s3 + $0x9] ss:$0 sm:$0xff] }
 0x8d6   :  { %v1474_v4 = vpop.f32.mrf.mxu1 }
 0x8d7   :  { %v936_v8 = vadd.f32 %v931_v2, %v1661_v34 }
 0x8d8   :  { %v890_v10 = vpop.f32.mrf.mxu1 }
 0x8d9   :  { %v937_v12 = vadd.f32 %v1310_v11, %v936_v8 }
 0x8da   :  { %v1475_v13 = vpop.f32.mrf.mxu1 }
 0x8db   :  { %v938_v14 = vsel %vm26_vm0, %v937_v12, 0.0 }
 0x8dc   :  { %939 = vadd.xlane.f32.xlu0 %v938_v14 }
 0x8e0   :  { %601 = vadd.xlane.f32.xlu0 %v600_v3 }
 0x965   :  { %v940_v9 = vpop.xlane.xlu0 %939 }
 0x966   :  { %v941_v17 = vmul.f32 0.03125, %v940_v9 }
 0x968   :  { %v942_v18 = vsub.f32 %v937_v12, %v941_v17  ;;  %v1536_v17 = vld [vmem:[%s1886_s2 + $0x78] sm:$0xff]  }
 0x969   :  { %v602_v33 = vpop.xlane.xlu0 %601 }
 0x96a   :  { %v603_v19 = vmul.f32 0.03125, %v602_v33  ;;  %v943_v34 = vmul.f32 %v942_v18, %v942_v18 }
 0x96c   :  { %v604_v20 = vsub.f32 %v599_v15, %v603_v19  ;;  %v944_v21 = vsel %vm26_vm0, %v943_v34, 0.0 }
 0x96d   :  { %945 = vadd.xlane.f32.xlu0 %v944_v21  ;;  %v1329_v21 = vld [vmem:[%s1887_s3 + $0xa] ss:$0 sm:$0xff] }
 0x96e   :  { %v605_v22 = vmul.f32 %v604_v20, %v604_v20 }
 0x970   :  { %v606_v23 = vsel %vm26_vm0, %v605_v22, 0.0 }
 0x971   :  { %607 = vadd.xlane.f32.xlu0 %v606_v23  ;;  %v1330_v23 = vld [vmem:[%s1887_s3 + $0xb] ss:$0 sm:$0xff] }
 0x9f6   :  { %v946_v26 = vpop.xlane.xlu0 %945 }
 0x9f7   :  { %v947_v27 = vmul.f32 0.03125, %v946_v26 }
 0x9f9   :  { %v948_v6 = vadd.f32 1e-12, %v947_v27  ;;  %v1538_v27 = vld [vmem:[%s1886_s2 + $0x88] sm:$0xff]  }
 0x9fa   :  { %v608_v28 = vpop.xlane.xlu0 %607 }
 0x9fb   :  { %1560 = vrsqrt.f32 %v948_v6  ;;  %v609_v7 = vmul.f32 0.03125, %v608_v28  ;;  %v1539_v6 = vld [vmem:[%s1886_s2 + $0x80] sm:$0xff]   ;;  %v1331_v28 = vld [vmem:[%s1887_s3 + $0xc] ss:$0 sm:$0xff] }
 0x9fd   :  { %v610_v29 = vadd.f32 1e-12, %v609_v7 }
 0x9ff   :  { %1562 = vrsqrt.f32 %v610_v29 }
 0xa08   :  { %v1561_v30 = vpop.eup %1560 }
 0xa09   :  { %v950_v32 = vmul.f32 %v1561_v30, %v942_v18  ;;  %v1537_v18 = vld [vmem:[%s1886_s2 + $0x70] sm:$0xff]   ;;  %s1595_s2 = smov [#allocation2]  }
 0xa0a   :  { %s1280_s29 = sshll.u32 %s1595_s2, 4  ;;  %s1281_s29 = int_to_ptr.vmem [resolvable:$true] %s1280_s29 }
 0xa0b   :  { %v951_v36 = vmul.f32 %v1311_v31, %v950_v32  ;;  %s1570_s30 = scalar_lea.vmem %s1281_s29, 32  ;;  %p1575_p1 = scmp.lt.s32.totalorder %s1281_s29, %s1281_s29 }
 0xa0c   :  { %v1563_v37 = vpop.eup %1562  ;;  %p1571_p0 = scmp.ne.s32.totalorder %s1281_s29, %s1570_s30  ;;  %p1576_p2 = scmp.lt.s32.totalorder %s1570_s30, %s1570_s30 }
 0xa0d   :  { %v612_v38 = vmul.f32 %v1563_v37, %v604_v20  ;;  %v952_v39 = vadd.f32 %v1312_v35, %v951_v36 }
 0xa0e   :  { %p1577_p3 = por %p1576_p2, %p1575_p1 }
 0xa0f   :  { %v617_v40 = vmul.f32 %v1311_v31, %v612_v38  ;;  %v954_v42 = vrot.slane %v952_v39, 7 }
 0xa10   :  { %p1578_p4 = pnand %p1577_p3, %p1571_p0 }
 0xa11   :  { %v622_v41 = vadd.f32 %v1312_v35, %v617_v40 }
 0xa13   :  { %v957_v43 = vsel %vm956_vm5, %v622_v41, %v954_v42 }
 0xa14   :  { %v958_v44 = vpack.c.bf16 %v957_v43, %v957_v43 }
 0xa16   :  { %1487 = vmatmul.mubr.msk.bf16.vlgmr.msra.gmra.mxu1 %vm26_vm0, %v958_v44 }
 0xa17   :  { %1506 = vmatprep.mubr.msk.bf16.mxu1 %vm1593_vm1, %v1592_v16  ;;  %1503 = vmatpush3.bf16.msra.mxu1 %v1536_v17 }
 0xa18   :  { %1504 = vmatprep.subr.bf16.mxu1 %v1592_v16 }
 0xa1b   :  { %1505 = vmatpush3.bf16.msra.mxu1 %v1537_v18 }
 0xa1c   :  { %1510 = vmatprep.subr.bf16.mxu1 %v1592_v16 }
 0xad6   :  { %v1017_v51 = vpop.f32.mrf.mxu1 }
 0xad7   :  { %v1018_v52 = vadd.f32 %v1319_v50, %v1017_v51 }
 0xad8   :  { %v1488_v53 = vpop.f32.mrf.mxu1 }
 0xad9   :  { %v1024_v54 = vmul.f32 0.044715, %v1018_v52  ;;  %v1023_v61 = vmul.f32 0.5, %v1018_v52 }
 0xada   :  { %v1020_v55 = vpop.f32.mrf.mxu1 }
 0xadb   :  { %v1025_v56 = vmul.f32 %v1024_v54, %v1018_v52 }
 0xadc   :  { %v1489_v57 = vpop.f32.mrf.mxu1 }
 0xadd   :  { %v1026_v58 = vmul.f32 %v1025_v56, %v1018_v52 }
 0xadf   :  { %v1027_v49 = vadd.f32 %v1026_v58, %v1018_v52 }
 0xae1   :  { %v1028_v59 = vmul.f32 0.7978846, %v1027_v49 }
 0xae3   :  { %1564 = vtanh.f32 %v1028_v59 }
 0xaf0   :  { %v1565_v60 = vpop.eup %1564 }
 0xaf1   :  { %v1030_v62 = vadd.f32 1.0, %v1565_v60 }
 0xaf3   :  { %v1031_v63 = vmul.f32 %v1030_v62, %v1023_v61 }
 0xaf5   :  { %v1032_v0 = vpack.c.bf16 %v1031_v63, %v1031_v63 }
 0xaf7   :  { %1499 = vmatmul.mubr.msk.bf16.vlgmr.msra.gmra.mxu0 %vm1070_vm6, %v1032_v0 }
 0xbb7   :  { %v1108_v2 = vpop.f32.mrf.mxu0 }
 0xbb8   :  { %v1109_v4 = vadd.f32 %v1323_v1, %v1108_v2 }
 0xbb9   :  { %v1500_v5 = vpop.f32.mrf.mxu0 }
 0xbba   :  { %v1114_v8 = vadd.f32 %v1109_v4, %v957_v43 }
 0xbbb   :  { %v1111_v10 = vpop.f32.mrf.mxu0 }
 0xbbc   :  { %v1118_v11 = vsel %vm1117_vm7, %v1114_v8, 0.0 }
 0xbbd   :  { %1119 = vadd.xlane.f32.xlu1 %v1118_v11  ;;  %v1501_v12 = vpop.f32.mrf.mxu0 }
 0xc46   :  { %v1120_v13 = vpop.xlane.xlu1 %1119 }
 0xc47   :  { %v1121_v14 = vmul.f32 0.03125, %v1120_v13 }
 0xc49   :  { %v1122_v15 = vsub.f32 %v1114_v8, %v1121_v14 }
 0xc4b   :  { %v1123_v3 = vmul.f32 %v1122_v15, %v1122_v15 }
 0xc4d   :  { %v1124_v9 = vsel %vm1117_vm7, %v1123_v3, 0.0 }
 0xc4e   :  { %1125 = vadd.xlane.f32.xlu0 %v1124_v9 }
 0xcd7   :  { %v1126_v33 = vpop.xlane.xlu0 %1125 }
 0xcd8   :  { %v1127_v19 = vmul.f32 0.03125, %v1126_v33 }
 0xcda   :  { %v1128_v34 = vadd.f32 1e-12, %v1127_v19 }
 0xcdc   :  { %1566 = vrsqrt.f32 %v1128_v34 }
 0xce9   :  { %v1567_v20 = vpop.eup %1566 }
 0xcea   :  { %v1130_v22 = vmul.f32 %v1567_v20, %v1122_v15 }
 0xcec   :  { %v1135_v24 = vmul.f32 %v1329_v21, %v1130_v22 }
 0xcee   :  { %v1140_v25 = vadd.f32 %v1330_v23, %v1135_v24 }
 0xcf0   :  { %v1141_v26 = vpack.c.bf16 %v1140_v25, %v1140_v25 }
 0xcf2   :  { %1507 = vmatmul.mubr.msk.bf16.vlgmr.msra.gmra.mxu1 %vm26_vm0, %v1141_v26 }
 0xcf3   :  { %1514 = vmatprep.mubr.msk.bf16.mxu1 %vm1593_vm1, %v1592_v16  ;;  %1511 = vmatpush3.bf16.msra.mxu1 %v1538_v27 }
 0xcf4   :  { %1512 = vmatprep.subr.bf16.mxu1 %v1592_v16  ;;  %v1335_v16 = vld [vmem:[%s1887_s3 + $0xd] ss:$0 sm:$0xff] }
 0xcf7   :  { %1513 = vmatpush3.bf16.msra.mxu1 %v1539_v6 }
 0xdb2   :  { %v1200_v7 = vpop.f32.mrf.mxu1 }
 0xdb3   :  { %v1201_v29 = vadd.f32 %v1331_v28, %v1200_v7 }
 0xdb4   :  { %v1508_v30 = vpop.f32.mrf.mxu1 }
 0xdb5   :  { %1568 = vtanh.f32 %v1201_v29 }
 0xdb6   :  { %v1203_v31 = vpop.f32.mrf.mxu1 }
 0xdb8   :  { %v1509_v32 = vpop.f32.mrf.mxu1 }
 0xdc2   :  { %v1569_v35 = vpop.eup %1568 }
 0xdc3   :  { %v1207_v36 = vpack.c.bf16 %v1569_v35, %v1569_v35 }
 0xdc5   :  { %1515 = vmatmul.mubr.msk.bf16.vlgmr.msra.gmra.mxu1 %vm26_vm0, %v1207_v36 }
 0xe85   :  { %v1266_v37 = vpop.f32.mrf.mxu1 }
 0xe86   :  { %v1267_v38 = vadd.f32 %v1335_v16, %v1266_v37 }
 0xe87   :  { %v1516_v39 = vpop.f32.mrf.mxu1 }
 0xe88   :  { %1273 = vst.msk [vmem:[#allocation2] sm:$0x3] %vm1272_vm8, %v1267_v38 }
 0xe89   :  { %v1269_v40 = vpop.f32.mrf.mxu1 }
 0xe8a   :  { %1581 = shalt.err (!%p1578_p4)
}
 0xe8b   :  { %1283 = dma.vmem_to_hbm [thread:$0]  %s1281_s29, 32, %s1888_s4, [#allocation3]   ;;  %v1517_v41 = vpop.f32.mrf.mxu1 }
 0xe8c   :  { %1590 = dma.done.wait [#allocation3], 32  }
 0xe8d   :  { %1591 = vsyncadd [#allocation3], 4294967264 }
 0xe8e   :  { %1287 = vsyncpa [#allocation3], 1 }

</bundles_post_ra>
